<compile_context>
chip_gen: v5e
topology: v5e:2x2
jax: 0.10.0
libtpu: 0.0.40
codegen_flags: <defaults>
</compile_context>

<pallas_src>
import jax
import jax.numpy as jnp
from jax.experimental import pallas as pl
from jax.experimental.pallas import tpu as pltpu

_FAR = 1.0e15  # padding coordinate for padded seed columns (never the nearest)


def _meanshift_kernel(t_ref, p_ref, mins_sum_ref, seeds_ref, rowmin_ref):
    # t_ref:        (Bt, D, N)   true positions, points on the lane axis (resident)
    # p_ref:        (Bt, D, tM)  predicted positions (current M tile), seeds on lanes
    # mins_sum_ref: (Bt, 1)      sum_n min_m dist(n, m)   (written at last M tile)
    # seeds_ref:    (Bt, tM)     min_n dist(n, m) for this M tile
    # rowmin_ref:   (Bt, N)      running min over M tiles of SQUARED distances
    m_idx = pl.program_id(1)

    t = t_ref[...].astype(jnp.float32)          # (Bt, D, N)
    p = p_ref[...].astype(jnp.float32)          # (Bt, D, tM)
    d = t.shape[1]

    # Squared Euclidean distances with seeds on sublanes, true points on lanes:
    #   d2[b, m, n] = sum_k (t[b, k, n] - p[b, k, m])^2   (VPU; D is tiny, no MXU)
    def sq_term(k):
        diff = t[:, k, None, :] - p[:, k, :, None]       # (Bt, tM, N), lane-dense
        return diff * diff

    d2 = sq_term(0)                                      # init from k=0 term
    for k in range(1, d):                                # static loop, D == 3
        d2 = d2 + sq_term(k)

    # Per-seed nearest distance for this tile (cross-lane min over N), sqrt after min.
    seeds_ref[...] = jnp.sqrt(jnp.min(d2, axis=2))       # (Bt, tM)

    # Running per-true-point min over the M (seed) axis: sublane-direction reduce,
    # lands lane-dense in rowmin_ref, kept as squared distances.
    tile_rowmin = jnp.min(d2, axis=1)                    # (Bt, N)

    @pl.when(m_idx == 0)
    def _():
        rowmin_ref[...] = tile_rowmin

    @pl.when(m_idx > 0)
    def _():
        rowmin_ref[...] = jnp.minimum(rowmin_ref[...], tile_rowmin)

    @pl.when(m_idx == pl.num_programs(1) - 1)
    def _():
        # sqrt only N values, reduce to a per-batch sum (only mean(mins) is used).
        mins_sum_ref[...] = jnp.sum(
            jnp.sqrt(rowmin_ref[...]), axis=1, keepdims=True)    # (Bt, 1)


# ----------------------------------------------------------------------------- #
# Generation-aware VMEM planning
# ----------------------------------------------------------------------------- #
def _pad_to(x, m):
    return -(-x // m) * m


def _vmem_caps():
    try:
        cap = int(pltpu.get_tpu_info().vmem_capacity_bytes)
    except Exception:
        cap = 64 << 20                       # conservative fallback (v7x per-TC size)
    budget = min(int(cap * 0.75), 96 << 20)  # v5e/v6e: 96 MiB, v7x: ~48 MiB
    ceiling = int(cap * 0.9)
    return budget, ceiling


def _plan_bytes(Bt, Nc, tM, D):
    """Approximate per-step VMEM footprint (bytes), incl. (8,128) tile padding."""
    f32, SL, LN = 4, 8, 128
    nc = _pad_to(max(Nc, 1), LN)
    tm_l = _pad_to(max(tM, 1), LN)           # tM on the lane axis (p tile / seeds out)
    tm_s = _pad_to(max(tM, 1), SL)           # tM on the sublane axis (d2)
    bt = _pad_to(max(Bt, 1), SL)
    dp = _pad_to(max(D, 1), SL)
    t_in = 2 * Bt * dp * nc * f32            # double-buffered resident true-point block
    p_in = 2 * Bt * dp * tm_l * f32          # double-buffered seed block
    d2 = 3 * Bt * tm_s * nc * f32            # d2 + ~2 live diff temps
    rowmin = bt * nc * f32                   # running rowmin scratch
    outs = 2 * bt * LN * f32 + 2 * bt * tm_l * f32
    return t_in + p_in + d2 + rowmin + outs + (2 << 20)


def _plan(B, N, M, D):
    """Returns (Bt, B_pad, N_chunk, tM, M_pad, vmem_limit_bytes)."""
    budget, ceiling = _vmem_caps()

    # Batch tile: full batch when small; otherwise 8-row blocks (B padded) so v7x
    # gets >= 2 "parallel" grid iterations to shard across its two TensorCores.
    # TODO(synk): B <= 8 cannot be sharded across v7x's two cores without also
    #             splitting M over a leading core axis and merging partial rowmins.
    if B <= 8:
        Bt, B_pad = B, B
    else:
        B_pad = _pad_to(B, 8)
        Bt = 8

    # Wrapper-level N chunking: shrink until even a minimal (<=128-col) M tile fits.
    Nc = N
    while Nc > 1 and _plan_bytes(Bt, Nc, min(M, 128), D) > budget:
        Nc = max(1, Nc // 2)

    # M tile: full M if it fits, else the largest multiple of 128 that fits, with
    # M padded up to a whole number of evenly sized tiles.
    if _plan_bytes(Bt, Nc, M, D) <= budget:
        tM, M_pad = M, M
    else:
        base = _plan_bytes(Bt, Nc, 128, D)
        per_blk = max(1, _plan_bytes(Bt, Nc, 256, D) - base)  # cost of +128 columns
        max_blk = 1 + max(0, int((budget - base) // per_blk))
        nb = _pad_to(M, 128) // 128
        ntiles = -(-nb // max_blk)
        blk = -(-nb // ntiles)
        tM = blk * 128
        M_pad = tM * ntiles

    vmem_limit = int(min(ceiling,
                         max(32 << 20, _plan_bytes(Bt, Nc, tM, D) + (8 << 20))))
    return Bt, B_pad, Nc, tM, M_pad, vmem_limit


# ----------------------------------------------------------------------------- #
# Wrapper
# ----------------------------------------------------------------------------- #
def _pairwise_min_stats(true_pos, pred_pos, plan=None):
    """Returns (mins_sum: (B,), mins_seeds: (B, M)) computed by the Pallas kernel."""
    B, N, D = true_pos.shape
    Bp, M, Dp = pred_pos.shape
    assert B == Bp and D == Dp

    if plan is None:
        plan = _plan(B, N, M, D)
    Bt, B_pad, Nc, tM, M_pad, vmem_limit = plan

    # Lane-dense layout: coordinates on sublanes, points on the lane axis.
    t_lane = jnp.transpose(true_pos, (0, 2, 1)).astype(jnp.float32)   # (B, D, N)
    p_lane = jnp.transpose(pred_pos, (0, 2, 1)).astype(jnp.float32)   # (B, D, M)

    if B_pad != B:   # pad batch with zeros; padded rows are sliced off below
        t_lane = jnp.pad(t_lane, ((0, B_pad - B), (0, 0), (0, 0)))
        p_lane = jnp.pad(p_lane, ((0, B_pad - B), (0, 0), (0, 0)))
    if M_pad != M:   # pad seeds with a far-away point; never the nearest neighbor
        p_lane = jnp.pad(p_lane, ((0, 0), (0, 0), (0, M_pad - M)),
                         constant_values=_FAR)

    compiler_params = pltpu.CompilerParams(
        dimension_semantics=("parallel", "arbitrary"),
        vmem_limit_bytes=vmem_limit)

    def run_chunk(t_chunk):
        n_chunk = t_chunk.shape[-1]
        grid = (B_pad // Bt, M_pad // tM)
        return pl.pallas_call(
            _meanshift_kernel,
            out_shape=(
                jax.ShapeDtypeStruct((B_pad, 1), jnp.float32),
                jax.ShapeDtypeStruct((B_pad, M_pad), jnp.float32),
            ),
            grid_spec=pltpu.PrefetchScalarGridSpec(
                num_scalar_prefetch=0,
                grid=grid,
                in_specs=[
                    pl.BlockSpec((Bt, D, n_chunk), lambda b, m: (b, 0, 0)),
                    pl.BlockSpec((Bt, D, tM), lambda b, m: (b, 0, m)),
                ],
                out_specs=[
                    pl.BlockSpec((Bt, 1), lambda b, m: (b, 0)),    # resident across m
                    pl.BlockSpec((Bt, tM), lambda b, m: (b, m)),
                ],
                scratch_shapes=[pltpu.VMEM((Bt, n_chunk), jnp.float32)],
            ),
            compiler_params=compiler_params,
        )(t_chunk, p_lane)

    # Wrapper-level N chunking (min-of-sqrt == sqrt-of-min, so partials combine
    # exactly with jnp.minimum / sums).  Single chunk in the common case.
    n_chunks = -(-N // Nc)
    mins_sum = None
    seeds = None
    for c in range(n_chunks):
        lo = c * Nc
        hi = min(N, lo + Nc)
        s2, sd = run_chunk(t_lane[:, :, lo:hi])
        mins_sum = s2[:, 0] if mins_sum is None else mins_sum + s2[:, 0]
        seeds = sd if seeds is None else jnp.minimum(seeds, sd)

    return mins_sum[:B], seeds[:B, :M]


def mean_shift_loss(true_pos, pred_pos, use_loss=True, dummy=None):
    """JAX/Pallas equivalent of MeanShift_loss.forward."""
    true_pos = jnp.asarray(true_pos, jnp.float32)   # .float()
    pred_pos = jnp.asarray(pred_pos, jnp.float32)
    B, N, _ = true_pos.shape

    mins_sum, mins_seeds = _pairwise_min_stats(true_pos, pred_pos)

    loss = jnp.sum(mins_sum) / jnp.float32(B * N)   # == mean(mins)
    loss_seeds = jnp.mean(mins_seeds)
    # NOTE: the PyTorch module prints (loss, loss_seeds) here; the host-side print
    # side-effect is intentionally omitted to keep script output clean.
    just_in_case_losses = (loss, loss_seeds)
    if not use_loss:
        return (jnp.zeros((), jnp.float32), mins_seeds, just_in_case_losses)
    return (loss + loss_seeds, mins_seeds, just_in_case_losses)


def _reference(true_pos, pred_pos):
    # Pure-JAX reference for correctness checking.
    t = jnp.asarray(true_pos, jnp.float32)
    p = jnp.asarray(pred_pos, jnp.float32)
    diff = t[:, :, None, :] - p[:, None, :, :]
    dists = jnp.sqrt(jnp.sum(diff * diff, axis=-1))
    mins = jnp.min(dists, axis=2)
    mins_seeds = jnp.min(dists, axis=1)
    return jnp.mean(mins), jnp.mean(mins_seeds), mins_seeds


if __name__ == "__main__":
    key = jax.random.PRNGKey(0)

    def check(B, N, M, D, plan=None):
        k1, k2 = jax.random.split(jax.random.fold_in(key, B * 100000 + N * 100 + M))
        tp = jax.random.normal(k1, (B, N, D), dtype=jnp.float32) * 10.0
        pp = jax.random.normal(k2, (B, M, D), dtype=jnp.float32) * 10.0

        mins_sum, mins_seeds = _pairwise_min_stats(tp, pp, plan=plan)
        loss = jnp.sum(mins_sum) / jnp.float32(B * N)
        loss_seeds = jnp.mean(mins_seeds)
        jax.block_until_ready((loss, loss_seeds, mins_seeds))

        ref_loss, ref_loss_seeds, ref_seeds = _reference(tp, pp)
        assert jnp.allclose(loss, ref_loss, atol=1e-4, rtol=1e-4)
        assert jnp.allclose(loss_seeds, ref_loss_seeds, atol=1e-4, rtol=1e-4)
        assert jnp.allclose(mins_seeds, ref_seeds, atol=1e-4, rtol=1e-4)
        return tp, pp

    # 1) Small shape; also exercise the full public API (use_loss True / False).
    B, N, M, D = 2, 16, 8, 3
    true_pos, pred_pos = check(B, N, M, D)
    total_loss, mins_seeds, (loss, loss_seeds) = mean_shift_loss(
        true_pos, pred_pos, use_loss=True)
    jax.block_until_ready((total_loss, mins_seeds, loss, loss_seeds))
    ref_loss, ref_loss_seeds, ref_seeds = _reference(true_pos, pred_pos)
    assert jnp.allclose(loss, ref_loss, atol=1e-4, rtol=1e-4)
    assert jnp.allclose(loss_seeds, ref_loss_seeds, atol=1e-4, rtol=1e-4)
    assert jnp.allclose(mins_seeds, ref_seeds, atol=1e-4, rtol=1e-4)
    assert jnp.allclose(total_loss, ref_loss + ref_loss_seeds, atol=1e-4, rtol=1e-4)
    zero, seeds2, _ = mean_shift_loss(true_pos, pred_pos, use_loss=False)
    jax.block_until_ready((zero, seeds2))
    assert jnp.allclose(zero, 0.0)
    assert jnp.allclose(seeds2, ref_seeds, atol=1e-4, rtol=1e-4)

    # 2) B > 8 exercises batch padding and >= 2 "parallel" batch blocks (v7x path).
    check(10, 64, 40, 3)

    # 3) Forced small-tile plan exercises M padding + multi-M-tile rowmin
    #    accumulation + wrapper-level N chunking (the large-shape fallback paths).
    auto = _plan(2, 40, 200, 3)
    forced = (auto[0], auto[1], 16, 128, 256, auto[5])
    check(2, 40, 200, 3, plan=forced)

    print("KERNEL_OK")
</pallas_src>

<mosaic_0001>
module attributes {stable_mosaic.version = 11 : i64} {
  func.func @_meanshift_kernel(%arg0: i32, %arg1: i32, %arg2: memref<2x3x16xf32, #tpu.memory_space<vmem>>, %arg3: memref<2x3x8xf32, #tpu.memory_space<vmem>>, %arg4: memref<2x1xf32, #tpu.memory_space<vmem>>, %arg5: memref<2x8xf32, #tpu.memory_space<vmem>>, %arg6: memref<2x16xf32, #tpu.memory_space<vmem>>) attributes {dimension_semantics = [#tpu.dimension_semantics<parallel>, #tpu.dimension_semantics<arbitrary>], iteration_bounds = array<i64: 1, 1>, scalar_prefetch = 0 : i64, scratch_operands = 1 : i64, tpu.core_type = #tpu.core_type<tc>, window_params = [{transform_indices = @transform_0, window_bounds = array<i64: 2, 3, 16>}, {transform_indices = @transform_1, window_bounds = array<i64: 2, 3, 8>}, {transform_indices = @transform_2, window_bounds = array<i64: 2, 1>}, {transform_indices = @transform_3, window_bounds = array<i64: 2, 8>}]} {
    %c0 = arith.constant 0 : index
    %c0_0 = arith.constant 0 : index
    %c0_1 = arith.constant 0 : index
    %0 = vector.load %arg2[%c0, %c0_0, %c0_1] : memref<2x3x16xf32, #tpu.memory_space<vmem>>, vector<2x3x16xf32>
    %c0_2 = arith.constant 0 : index
    %c0_3 = arith.constant 0 : index
    %c0_4 = arith.constant 0 : index
    %1 = vector.load %arg3[%c0_2, %c0_3, %c0_4] : memref<2x3x8xf32, #tpu.memory_space<vmem>>, vector<2x3x8xf32>
    %2 = vector.extract_strided_slice %0 {offsets = [0, 0, 0], sizes = [2, 1, 16], strides = [1, 1, 1]} : vector<2x3x16xf32> to vector<2x1x16xf32>
    %3 = vector.shape_cast %2 : vector<2x1x16xf32> to vector<2x16xf32>
    %4 = vector.shape_cast %3 : vector<2x16xf32> to vector<2x1x16xf32>
    %5 = vector.extract_strided_slice %1 {offsets = [0, 0, 0], sizes = [2, 1, 8], strides = [1, 1, 1]} : vector<2x3x8xf32> to vector<2x1x8xf32>
    %6 = vector.shape_cast %5 : vector<2x1x8xf32> to vector<2x8xf32>
    %7 = vector.shape_cast %6 : vector<2x8xf32> to vector<2x8x1xf32>
    %8 = vector.broadcast %4 : vector<2x1x16xf32> to vector<2x8x16xf32>
    %9 = vector.broadcast %7 : vector<2x8x1xf32> to vector<2x8x16xf32>
    %10 = arith.subf %8, %9 : vector<2x8x16xf32>
    %11 = arith.mulf %10, %10 : vector<2x8x16xf32>
    %12 = vector.extract_strided_slice %0 {offsets = [0, 1, 0], sizes = [2, 1, 16], strides = [1, 1, 1]} : vector<2x3x16xf32> to vector<2x1x16xf32>
    %13 = vector.shape_cast %12 : vector<2x1x16xf32> to vector<2x16xf32>
    %14 = vector.shape_cast %13 : vector<2x16xf32> to vector<2x1x16xf32>
    %15 = vector.extract_strided_slice %1 {offsets = [0, 1, 0], sizes = [2, 1, 8], strides = [1, 1, 1]} : vector<2x3x8xf32> to vector<2x1x8xf32>
    %16 = vector.shape_cast %15 : vector<2x1x8xf32> to vector<2x8xf32>
    %17 = vector.shape_cast %16 : vector<2x8xf32> to vector<2x8x1xf32>
    %18 = vector.broadcast %14 : vector<2x1x16xf32> to vector<2x8x16xf32>
    %19 = vector.broadcast %17 : vector<2x8x1xf32> to vector<2x8x16xf32>
    %20 = arith.subf %18, %19 : vector<2x8x16xf32>
    %21 = arith.mulf %20, %20 : vector<2x8x16xf32>
    %22 = arith.addf %11, %21 : vector<2x8x16xf32>
    %23 = vector.extract_strided_slice %0 {offsets = [0, 2, 0], sizes = [2, 1, 16], strides = [1, 1, 1]} : vector<2x3x16xf32> to vector<2x1x16xf32>
    %24 = vector.shape_cast %23 : vector<2x1x16xf32> to vector<2x16xf32>
    %25 = vector.shape_cast %24 : vector<2x16xf32> to vector<2x1x16xf32>
    %26 = vector.extract_strided_slice %1 {offsets = [0, 2, 0], sizes = [2, 1, 8], strides = [1, 1, 1]} : vector<2x3x8xf32> to vector<2x1x8xf32>
    %27 = vector.shape_cast %26 : vector<2x1x8xf32> to vector<2x8xf32>
    %28 = vector.shape_cast %27 : vector<2x8xf32> to vector<2x8x1xf32>
    %29 = vector.broadcast %25 : vector<2x1x16xf32> to vector<2x8x16xf32>
    %30 = vector.broadcast %28 : vector<2x8x1xf32> to vector<2x8x16xf32>
    %31 = arith.subf %29, %30 : vector<2x8x16xf32>
    %32 = arith.mulf %31, %31 : vector<2x8x16xf32>
    %33 = arith.addf %22, %32 : vector<2x8x16xf32>
    %cst = arith.constant dense<0x7F800000> : vector<2x8xf32>
    %34 = vector.multi_reduction <minimumf>, %33, %cst [2] : vector<2x8x16xf32> to vector<2x8xf32>
    %35 = math.sqrt %34 : vector<2x8xf32>
    %c0_5 = arith.constant 0 : index
    %c0_6 = arith.constant 0 : index
    %36 = vector.load %arg5[%c0_5, %c0_6] : memref<2x8xf32, #tpu.memory_space<vmem>>, vector<2x8xf32>
    tpu.vector_store %arg5[%c0_5, %c0_6], %35 {strides = array<i32>} : memref<2x8xf32, #tpu.memory_space<vmem>>, vector<2x8xf32>,
    %cst_7 = arith.constant dense<0x7F800000> : vector<2x16xf32>
    %37 = vector.multi_reduction <minimumf>, %33, %cst_7 [1] : vector<2x8x16xf32> to vector<2x16xf32>
    %c0_i32 = arith.constant 0 : i32
    %38 = arith.cmpi eq, %arg1, %c0_i32 : i32
    %39 = arith.extui %38 : i1 to i32
    %c0_i32_8 = arith.constant 0 : i32
    %40 = arith.cmpi ne, %39, %c0_i32_8 : i32
    scf.if %40 {
      %c0_13 = arith.constant 0 : index
      %c0_14 = arith.constant 0 : index
      %47 = vector.load %arg6[%c0_13, %c0_14] : memref<2x16xf32, #tpu.memory_space<vmem>>, vector<2x16xf32>
      tpu.vector_store %arg6[%c0_13, %c0_14], %37 {strides = array<i32>} : memref<2x16xf32, #tpu.memory_space<vmem>>, vector<2x16xf32>,
    } else {
    }
    %c0_i32_9 = arith.constant 0 : i32
    %41 = arith.cmpi sgt, %arg1, %c0_i32_9 : i32
    %42 = arith.extui %41 : i1 to i32
    %c0_i32_10 = arith.constant 0 : i32
    %43 = arith.cmpi ne, %42, %c0_i32_10 : i32
    scf.if %43 {
      %c0_13 = arith.constant 0 : index
      %c0_14 = arith.constant 0 : index
      %47 = vector.load %arg6[%c0_13, %c0_14] : memref<2x16xf32, #tpu.memory_space<vmem>>, vector<2x16xf32>
      %48 = arith.minimumf %47, %37 : vector<2x16xf32>
      %c0_15 = arith.constant 0 : index
      %c0_16 = arith.constant 0 : index
      %49 = vector.load %arg6[%c0_15, %c0_16] : memref<2x16xf32, #tpu.memory_space<vmem>>, vector<2x16xf32>
      tpu.vector_store %arg6[%c0_15, %c0_16], %48 {strides = array<i32>} : memref<2x16xf32, #tpu.memory_space<vmem>>, vector<2x16xf32>,
    } else {
    }
    %c0_i32_11 = arith.constant 0 : i32
    %44 = arith.cmpi eq, %arg1, %c0_i32_11 : i32
    %45 = arith.extui %44 : i1 to i32
    %c0_i32_12 = arith.constant 0 : i32
    %46 = arith.cmpi ne, %45, %c0_i32_12 : i32
    scf.if %46 {
      %c0_13 = arith.constant 0 : index
      %c0_14 = arith.constant 0 : index
      %47 = vector.load %arg6[%c0_13, %c0_14] : memref<2x16xf32, #tpu.memory_space<vmem>>, vector<2x16xf32>
      %48 = math.sqrt %47 : vector<2x16xf32>
      %cst_15 = arith.constant dense<0.000000e+00> : vector<2xf32>
      %49 = vector.multi_reduction <add>, %48, %cst_15 [1] : vector<2x16xf32> to vector<2xf32>
      %50 = vector.shape_cast %49 : vector<2xf32> to vector<2x1xf32>
      %c0_16 = arith.constant 0 : index
      %c0_17 = arith.constant 0 : index
      %51 = vector.load %arg4[%c0_16, %c0_17] : memref<2x1xf32, #tpu.memory_space<vmem>>, vector<2x1xf32>
      tpu.vector_store %arg4[%c0_16, %c0_17], %50 {strides = array<i32>} : memref<2x1xf32, #tpu.memory_space<vmem>>, vector<2x1xf32>,
    } else {
    }
    return
  }
  func.func @transform_0(%arg0: i32, %arg1: i32) -> (i32, i32, i32) {
    %c0_i32 = arith.constant 0 : i32
    %c0_i32_0 = arith.constant 0 : i32
    %c0_i32_1 = arith.constant 0 : i32
    return %arg0, %c0_i32, %c0_i32_0 : i32, i32, i32
  }
  func.func @transform_1(%arg0: i32, %arg1: i32) -> (i32, i32, i32) {
    %c0_i32 = arith.constant 0 : i32
    %c0_i32_0 = arith.constant 0 : i32
    return %arg0, %c0_i32, %arg1 : i32, i32, i32
  }
  func.func @transform_2(%arg0: i32, %arg1: i32) -> (i32, i32) {
    %c0_i32 = arith.constant 0 : i32
    %c0_i32_0 = arith.constant 0 : i32
    return %arg0, %c0_i32 : i32, i32
  }
  func.func @transform_3(%arg0: i32, %arg1: i32) -> (i32, i32) {
    %c0_i32 = arith.constant 0 : i32
    return %arg0, %arg1 : i32, i32
  }
}

</mosaic_0001>

<bundles_post_ra>
// kernel: tpu_custom_call.1
= control target key start
LH: loop header
LB: loop body
LE: loop exit
PB: predicated region body
PF: predicated region fallthrough
CT: control target
= control target key end

     0   :  { %v19_v0 = vlaneseq  ;;  %s283_s0 = inlined_call_operand.vmem [shape: f32[2,3,16], index: 0, kind: input, shape index: {}]   ;;  %s284_s1 = inlined_call_operand.vmem [shape: f32[2,3,8], index: 1, kind: input, shape index: {}]   ;;  %s285_s2 = inlined_call_operand.vmem [shape: f32[2,1], index: 2, kind: output, shape index: {0}]   ;;  %s286_s3 = inlined_call_operand.hbm [shape: f32[2,8], index: 3, kind: output, shape index: {1}]  }
   0x1   :  { %9 = vsyncpa [#allocation4], 0  ;;  %v16_v2 = vld [vmem:[%s284_s1] sm:$0x7]  ;;  %v17_v6 = vld [vmem:[%s284_s1 + $0x4] sm:$0x7] }
   0x2   :  { %v20_v1 = vshrl.u32 %v19_v0, 7  ;;  %v38_v3 = vperm.slane %v16_v2, 1  ;;  %v18_v4 = vperm.slane %v16_v2, 0  ;;  %v60_v5 = vperm.slane %v16_v2, 2  ;;  %v14_v10 = vld [vmem:[%s283_s0] sm:$0x7] }
   0x3   :  { %v45_v7 = vperm.slane %v17_v6, 1  ;;  %v25_v8 = vperm.slane %v17_v6, 0  ;;  %v67_v9 = vperm.slane %v17_v6, 2  ;;  %v74_v11 = vperm.slane %v14_v10, 2  ;;  %v15_v20 = vld [vmem:[%s283_s0 + $0x4] sm:$0x7] }
   0x4   :  { %202 = vset.pattern.permute.xlu1 %v20_v1  ;;  %201 = vset.pattern.permute.xlu0 %v20_v1  ;;  %v52_v13 = vperm.slane %v14_v10, 1  ;;  %v32_v14 = vperm.slane %v14_v10, 0  ;;  %v75_v25 = vperm.slane %v15_v20, 2  ;;  %v53_v26 = vperm.slane %v15_v20, 1  ;;  %s236_s0 = smov [#allocation3]   ;;  %s189_s22 = sshll.u32 %s286_s3, 4  ;;  %s190_s22 = int_to_ptr.hbm [resolvable:$true] %s189_s22 }
   0x5   :  { %203 = vset.pattern.permute.xlu2 %v20_v1  ;;  %v33_v27 = vperm.slane %v15_v20, 0  ;;  %vm82_vm0 = vcmask 130048   ;;  %vm119_vm1 = vcmask 1041409   ;;  %vm144_vm2 = vcmask 123904   ;;  %s187_s19 = sshll.u32 %s236_s0, 4  ;;  %s188_s19 = int_to_ptr.vmem [resolvable:$true] %s187_s19 }
   0x6   :  { %vm122_vm9 = vcmask 58368   ;;  %vm178_vm10 = vcmask 1024  }
   0xc   :  { %43 = vperm.xlu1 %202, %v38_v3   ;;  %23 = vperm.xlu0 %201, %v18_v4  }
   0xd   :  { %65 = vperm.xlu2 %203, %v60_v5  }
  0x14   :  { %50 = vperm.xlu1 %202, %v45_v7   ;;  %30 = vperm.xlu0 %201, %v25_v8  }
  0x15   :  { %72 = vperm.xlu2 %203, %v67_v9  }
  0x67   :  { %v66_v12 = vpop.permute.xlu2 %65 }
  0x68   :  { %v76_v15 = vsub.f32 %v74_v11, %v66_v12 }
  0x6a   :  { %v78_v21 = vmul.f32 %v76_v15, %v76_v15 }
  0x6f   :  { %v73_v28 = vpop.permute.xlu2 %72 }
  0x70   :  { %v77_v32 = vsub.f32 %v75_v25, %v73_v28 }
  0x72   :  { %v79_v40 = vmul.f32 %v77_v32, %v77_v32 }
  0x7e   :  { %v44_v16 = vpop.permute.xlu1 %43  ;;  %v24_v17 = vpop.permute.xlu0 %23 }
  0x7f   :  { %v54_v18 = vsub.f32 %v52_v13, %v44_v16  ;;  %v34_v19 = vsub.f32 %v32_v14, %v24_v17 }
  0x81   :  { %v56_v22 = vmul.f32 %v54_v18, %v54_v18  ;;  %v36_v23 = vmul.f32 %v34_v19, %v34_v19 }
  0x83   :  { %v58_v24 = vadd.f32 %v56_v22, %v36_v23 }
  0x85   :  { %v80_v29 = vadd.f32 %v78_v21, %v58_v24  ;;  %v116_v21 = vand.u32 127, %v19_v0 }
  0x86   :  { %v51_v30 = vpop.permute.xlu1 %50  ;;  %v31_v31 = vpop.permute.xlu0 %30 }
  0x87   :  { %v55_v33 = vsub.f32 %v53_v26, %v51_v30  ;;  %v35_v34 = vsub.f32 %v33_v27, %v31_v31  ;;  %v83_v35 = vsel %vm82_vm0, %v80_v29, inf }
  0x88   :  { %84 = vmin.xlane.f32.xlu0 %v83_v35  ;;  %v124_v36 = vrot.slane %v83_v35, 4 }
  0x89   :  { %v57_v37 = vmul.f32 %v55_v33, %v55_v33  ;;  %v37_v38 = vmul.f32 %v35_v34, %v35_v34 }
  0x8a   :  { %v125_v39 = vmin.f32 %v83_v35, %v124_v36 }
  0x8b   :  { %v59_v41 = vadd.f32 %v57_v37, %v37_v38 }
  0x8c   :  { %v126_v43 = vrot.slane %v125_v39, 2 }
  0x8d   :  { %v81_v42 = vadd.f32 %v79_v40, %v59_v41 }
  0x8e   :  { %v127_v46 = vmin.f32 %v125_v39, %v126_v43 }
  0x8f   :  { %v86_v44 = vsel %vm82_vm0, %v81_v42, inf }
  0x90   :  { %87 = vmin.xlane.f32.xlu1 %v86_v44  ;;  %v130_v45 = vrot.slane %v86_v44, 4  ;;  %v128_v49 = vrot.slane %v127_v46, 1 }
  0x92   :  { %v131_v47 = vmin.f32 %v86_v44, %v130_v45  ;;  %v129_v52 = vmin.f32 %v127_v46, %v128_v49 }
  0x94   :  { %v132_v48 = vrot.slane %v131_v47, 2 }
  0x96   :  { %v133_v50 = vmin.f32 %v131_v47, %v132_v48 }
  0x98   :  { %v134_v51 = vrot.slane %v133_v50, 1 }
  0x9a   :  { %v135_v53 = vmin.f32 %v133_v50, %v134_v51 }
  0x9c   :  { %v142_v54 = vsel %vm119_vm1, %v135_v53, %v129_v52 }
  0x9d   :  { %145 = vst.msk [vmem:[#allocation2] sm:$0x3] %vm144_vm2, %v142_v54 }
  0xa4   :  { %v161_v55 = vld [vmem:[#allocation2] sm:$0x3] }
  0xa5   :  { %204 = vrsqrt.f32 %v161_v55  ;;  %vm169_vm3 = vcmp.eq.f32.partialorder %v161_v55, inf  ;;  %v172_v63 = vand.u32 2147483648, %v161_v55  ;;  %vm171_vm4 = vcmp.eq.f32.partialorder %v161_v55, 0.0 }
  0xab   :  { %v205_v56 = vpop.eup %204 }
  0xac   :  { %v163_v57 = vmul.f32 %v205_v56, %v161_v55 }
  0xae   :  { %v164_v58 = vmul.f32 %v205_v56, %v163_v57 }
  0xb0   :  { %v165_v59 = vmul.f32 0.5, %v164_v58 }
  0xb2   :  { %v166_v60 = vsub.f32 1.5, %v165_v59 }
  0xb4   :  { %v167_v61 = vmul.f32 %v205_v56, %v166_v60 }
  0xb6   :  { %v168_v62 = vmul.f32 %v167_v61, %v161_v55 }
  0xb8   :  { %v170_v1 = vsel %vm169_vm3, %v161_v55, %v168_v62 }
  0xb9   :  { %v173_v2 = vsel %vm171_vm4, %v172_v63, %v170_v1 }
  0xba   :  { %v175_v3 = vsel %vm144_vm2, %v173_v2, 0.0 }
  0xbb   :  { %176 = vadd.xlane.f32.xlu2 %v175_v3 }
  0xfb   :  { %v85_v4 = vpop.xlane.xlu0 %84 }
  0xfc   :  { %206 = vrsqrt.f32 %v85_v4  ;;  %vm96_vm5 = vcmp.eq.f32.partialorder %v85_v4, inf  ;;  %v99_v20 = vand.u32 2147483648, %v85_v4  ;;  %vm98_vm6 = vcmp.eq.f32.partialorder %v85_v4, 0.0 }
 0x102   :  { %v207_v5 = vpop.eup %206 }
 0x103   :  { %v90_v6 = vmul.f32 %v207_v5, %v85_v4  ;;  %v88_v7 = vpop.xlane.xlu1 %87 }
 0x104   :  { %208 = vrsqrt.f32 %v88_v7  ;;  %vm108_vm7 = vcmp.eq.f32.partialorder %v88_v7, inf  ;;  %v111_v23 = vand.u32 2147483648, %v88_v7  ;;  %vm110_vm8 = vcmp.eq.f32.partialorder %v88_v7, 0.0 }
 0x105   :  { %v91_v8 = vmul.f32 %v207_v5, %v90_v6 }
 0x107   :  { %v92_v9 = vmul.f32 0.5, %v91_v8 }
 0x109   :  { %v93_v10 = vsub.f32 1.5, %v92_v9 }
 0x10a   :  { %v209_v11 = vpop.eup %208 }
 0x10b   :  { %v94_v12 = vmul.f32 %v207_v5, %v93_v10  ;;  %v102_v13 = vmul.f32 %v209_v11, %v88_v7 }
 0x10d   :  { %v103_v14 = vmul.f32 %v209_v11, %v102_v13  ;;  %v95_v15 = vmul.f32 %v94_v12, %v85_v4 }
 0x10f   :  { %v104_v16 = vmul.f32 0.5, %v103_v14  ;;  %v97_v18 = vsel %vm96_vm5, %v85_v4, %v95_v15 }
 0x110   :  { %v100_v24 = vsel %vm98_vm6, %v99_v20, %v97_v18 }
 0x111   :  { %v105_v17 = vsub.f32 1.5, %v104_v16  ;;  %v117_v27 = vperm.slane %v100_v24, %v116_v21 }
 0x113   :  { %v106_v19 = vmul.f32 %v209_v11, %v105_v17 }
 0x115   :  { %v107_v22 = vmul.f32 %v106_v19, %v88_v7 }
 0x117   :  { %v109_v25 = vsel %vm108_vm7, %v88_v7, %v107_v22 }
 0x118   :  { %v112_v26 = vsel %vm110_vm8, %v111_v23, %v109_v25 }
 0x119   :  { %v118_v28 = vperm.slane %v112_v26, %v116_v21 }
 0x11b   :  { %v120_v0 = vsel %vm119_vm1, %v118_v28, %v117_v27 }
 0x11c   :  { %123 = vst.msk [vmem:[#allocation3] sm:$0x3] %vm122_vm9, %v120_v0 }
 0x11d   :  { %192 = dma.vmem_to_hbm [thread:$0]  %s188_s19, 32, %s190_s22, [#allocation4]  }
 0x12e   :  { %v177_v29 = vpop.xlane.xlu2 %176 }
 0x12f   :  { %179 = vst.msk [vmem:[%s285_s2] sm:$0x3] %vm178_vm10, %v177_v29 }
 0x130   :  { %234 = dma.done.wait [#allocation4], 32  }
 0x131   :  { %235 = vsyncadd [#allocation4], 4294967264 }
 0x132   :  { %199 = vsyncpa [#allocation4], 1 }

</bundles_post_ra>
